<compile_context>
chip_gen: v6e
topology: v6e:2x2x1
jax: 0.10.0
libtpu: 0.0.40
codegen_flags: <defaults>
</compile_context>

<pallas_src>
import functools

import jax
import jax.numpy as jnp
from jax.experimental import pallas as pl
from jax.experimental.pallas import tpu as pltpu


def _vmem_capacity_bytes():
    """Physical VMEM per TensorCore (generation-aware), with a safe fallback."""
    try:
        cap = int(getattr(pltpu.get_tpu_info(), "vmem_capacity_bytes", 0))
        if cap > 0:
            return cap
    except Exception:
        pass
    return 64 << 20          # conservative: assume v7x-sized VMEM


def _pick_row_tile(D, itemsize, budget_per_buf):
    """Largest MXU-friendly row tile TK (dividing D) whose A buffer fits budget."""
    for cand in (4096, 2048, 1024, 512, 256, 128):
        if cand <= D and D % cand == 0 and cand * D * itemsize <= budget_per_buf:
            return cand
    for cand in (64, 32, 16, 8):
        if cand <= D and D % cand == 0 and cand * D * itemsize <= budget_per_buf:
            return cand
    return 8


def _discriminator_kernel(knots, p,
                          x_ref, A_ref, w_ref, bias_ref,   # inputs
                          out_ref,                         # output
                          aug_ref, part_ref):              # VMEM scratch
    """Grid = (splits, row-tiles-per-split); axis 1 streams contiguous row
    tiles A[rows, :] of the bilinear weight.

      x_ref:    (B, p)    f32, resident
      A_ref:    (TK, D)   f32 or bf16, streamed contiguous row tile of A
      w_ref:    (1, D)    f32, resident linear weight (lane-major)
      bias_ref: (1, 1)    f32, resident bilinear bias
      out_ref:  (1, B, 1) f32, per-split partial output
      aug_ref:  (B, D)    f32 scratch: augmented features, built at k == 0
      part_ref: (B, D)    f32 scratch: running aug[:, rows] @ A[rows, :]
    """
    c = pl.program_id(0)             # split index (parallel across TensorCores)
    k = pl.program_id(1)             # row-tile index within split (reduction)
    tps = pl.num_programs(1)
    tk = A_ref.shape[0]

    @pl.when(k == 0)
    def _init():
        x = x_ref[...]                                    # (B, p)
        aug_ref[:, 0:p] = x
        for i, knot in enumerate(knots):                  # K is small; static unroll
            aug_ref[:, (i + 1) * p:(i + 2) * p] = jnp.maximum(x - knot, 0.0)
        part_ref[...] = jnp.zeros_like(part_ref)

    # Contiguous row block of A handled this step.
    row_start = pl.multiple_of((c * tps + k) * tk, tk)
    aug_rows = aug_ref[:, pl.ds(row_start, tk)]                       # (B, TK)
    # MXU: (B, TK) @ (TK, D) with f32 accumulation.  LHS is cast to A's dtype
    # so bf16 streaming keeps a single-pass bf16 matmul (no promotion of A).
    part_ref[...] += jnp.dot(aug_rows.astype(A_ref.dtype), A_ref[...],
                             preferred_element_type=jnp.float32)

    @pl.when(k == tps - 1)
    def _finalize():
        aug = aug_ref[...]                                            # (B, D)
        # Fold the linear term and bias only into split 0 so the cross-split
        # sum done by the caller stays exact.
        scale = jnp.where(c == 0, jnp.float32(1.0), jnp.float32(0.0))
        vals = (part_ref[...] + scale * w_ref[...]) * aug             # (B, D)
        out = jnp.sum(vals, axis=1, keepdims=True) + scale * bias_ref[...]
        out_ref[...] = out[None]                                      # (1, B, 1)


def discriminator_forward(x, knots, lin_w, bil_w, bil_b, *,
                          a_dtype=jnp.float32, tk=None, num_splits=None):
    """x: (B, p); knots: sequence of python floats; lin_w: (1, D);
    bil_w: (1, D, D); bil_b: (1,).

    a_dtype=jnp.bfloat16 halves HBM traffic on the dominant A stream (f32
    accumulation kept on the MXU; expect ~1e-3 relative error at D~512)."""
    x = jnp.asarray(x, jnp.float32)
    B, p = x.shape
    K = len(knots)
    D = (1 + K) * p
    assert p % 128 == 0, "p must be a multiple of 128 (lane alignment)"
    assert B % 8 == 0, "batch must be a multiple of 8 (sublane alignment)"
    assert lin_w.shape == (1, D) and bil_w.shape == (1, D, D) and bil_b.shape == (1,)

    a_dtype = jnp.dtype(a_dtype)
    A = jnp.asarray(bil_w).reshape(D, D).astype(a_dtype)   # squeeze out_features == 1
    w = jnp.asarray(lin_w, jnp.float32).reshape(1, D)      # lane-major linear weight
    bias = jnp.asarray(bil_b, jnp.float32).reshape(1, 1)

    # Generation-aware VMEM budgeting:
    #   v7x (64 MiB phys)     -> declare <= 40 MiB
    #   v5e/v6e (128 MiB phys) -> declare <= 80 MiB
    cap = _vmem_capacity_bytes()
    limit_clamp = min(cap * 5 // 8, 80 << 20)
    resident = 2 * B * D * 4                       # aug + partial f32 scratch
    small_io = 2 * (B * p + D + B + 128) * 4       # x / w / bias / out buffers
    headroom = 8 << 20
    if tk is None:
        budget_per_buf = max((limit_clamp - resident - small_io - headroom) // 2,
                             128 * D * a_dtype.itemsize)
        tk = _pick_row_tile(D, a_dtype.itemsize, budget_per_buf)
    assert D % tk == 0 and tk % 8 == 0
    num_tiles = D // tk

    if num_splits is None:
        num_splits = 2 if (num_tiles >= 2 and num_tiles % 2 == 0) else 1
    assert num_tiles % num_splits == 0
    tps = num_tiles // num_splits                  # row tiles per split

    # Never under-state the true footprint in the declared limit.
    need = 2 * tk * D * a_dtype.itemsize + resident + small_io + headroom
    vmem_bytes = int(max(need, 16 << 20))

    def a_index_map(c, k):
        return (c * tps + k, 0)

    kernel = functools.partial(
        _discriminator_kernel, tuple(float(kn) for kn in knots), p)

    partials = pl.pallas_call(
        kernel,
        out_shape=jax.ShapeDtypeStruct((num_splits, B, 1), jnp.float32),
        grid=(num_splits, tps),
        in_specs=[
            pl.BlockSpec((B, p), lambda c, k: (0, 0)),     # x: resident
            pl.BlockSpec((tk, D), a_index_map),            # A: contiguous row tiles
            pl.BlockSpec((1, D), lambda c, k: (0, 0)),     # w: resident
            pl.BlockSpec((1, 1), lambda c, k: (0, 0)),     # bilinear bias: resident
        ],
        out_specs=pl.BlockSpec((1, B, 1), lambda c, k: (c, 0, 0)),
        scratch_shapes=[
            pltpu.VMEM((B, D), jnp.float32),               # aug
            pltpu.VMEM((B, D), jnp.float32),               # partial = aug @ A-rows
        ],
        compiler_params=pltpu.CompilerParams(
            dimension_semantics=("parallel", "arbitrary"),
            vmem_limit_bytes=vmem_bytes,
        ),
        cost_estimate=pl.CostEstimate(
            flops=2 * B * D * D + 4 * B * D,
            transcendentals=0,
            bytes_accessed=int(D * D * a_dtype.itemsize
                               + 4 * (D + 1 + B * p + num_splits * B)),
        ),
    )(x, A, w, bias)

    return partials.sum(axis=0)                    # combine per-core partials -> (B, 1)


def discriminator_ref(x, knots, lin_w, bil_w, bil_b):
    """Pure-JAX reference (mirrors the PyTorch forward)."""
    parts = [x] + [jnp.maximum(x - k, 0.0) for k in knots]
    aug = jnp.concatenate(parts, axis=1)                          # (B, D)
    lin = aug @ lin_w.T                                           # (B, 1)
    quad = jnp.einsum("bi,oij,bj->bo", aug, bil_w, aug) + bil_b   # (B, 1)
    return lin + quad


if __name__ == "__main__":
    # Small, TPU-friendly shapes: p multiple of 128 (lane-aligned), B multiple of 8.
    p = 128
    knots = (-0.5, 0.0, 0.5)
    K = len(knots)
    D = (1 + K) * p          # 512
    B = 8

    key = jax.random.PRNGKey(0)
    k1, k2, k3, k4 = jax.random.split(key, 4)

    x = jax.random.normal(k1, (B, p), dtype=jnp.float32)
    scale = 1.0 / jnp.sqrt(jnp.float32(D))
    lin_w = jax.random.normal(k2, (1, D), dtype=jnp.float32) * scale     # Linear, bias=False
    bil_w = jax.random.normal(k3, (1, D, D), dtype=jnp.float32) * scale  # Bilinear weight
    bil_b = jax.random.normal(k4, (1,), dtype=jnp.float32) * scale       # Bilinear bias

    ref = discriminator_ref(x, jnp.array(knots, jnp.float32), lin_w, bil_w, bil_b)

    # 1) Default path: auto row-tile (tk=512 here -> single tile, single split).
    out_auto = jax.block_until_ready(
        discriminator_forward(x, knots, lin_w, bil_w, bil_b))
    assert out_auto.shape == (B, 1), out_auto.shape
    assert bool(jnp.allclose(out_auto, ref, atol=1e-3, rtol=1e-3)), (out_auto, ref)

    # 2) Streamed / accumulating / 2-split path (tk=128 -> 4 row tiles, 2 splits).
    out_tiled = jax.block_until_ready(
        discriminator_forward(x, knots, lin_w, bil_w, bil_b, tk=128))
    assert bool(jnp.allclose(out_tiled, ref, atol=1e-3, rtol=1e-3)), (out_tiled, ref)

    # 3) bf16-streamed A (halved HBM traffic on the dominant stream), looser tol.
    out_bf16 = jax.block_until_ready(
        discriminator_forward(x, knots, lin_w, bil_w, bil_b,
                              a_dtype=jnp.bfloat16, tk=128))
    assert bool(jnp.allclose(out_bf16, ref, atol=0.5, rtol=3e-2)), (out_bf16, ref)

    print("KERNEL_OK")
</pallas_src>

<mosaic_0001>
module attributes {stable_mosaic.version = 11 : i64} {
  func.func @_discriminator_kernel(%arg0: i32, %arg1: i32, %arg2: memref<8x128xf32, #tpu.memory_space<vmem>>, %arg3: memref<512x512xf32, #tpu.memory_space<vmem>>, %arg4: memref<1x512xf32, #tpu.memory_space<vmem>>, %arg5: memref<1x1xf32, #tpu.memory_space<vmem>>, %arg6: memref<1x8x1xf32, #tpu.memory_space<vmem>>, %arg7: memref<8x512xf32, #tpu.memory_space<vmem>>, %arg8: memref<8x512xf32, #tpu.memory_space<vmem>>) attributes {dimension_semantics = [#tpu.dimension_semantics<parallel>, #tpu.dimension_semantics<arbitrary>], iteration_bounds = array<i64: 1, 1>, scalar_prefetch = 0 : i64, scratch_operands = 2 : i64, tpu.core_type = #tpu.core_type<tc>, window_params = [{pipeline_mode = #tpu.pipeline_mode<synchronous>, transform_indices = @transform_0, window_bounds = array<i64: 8, 128>}, {transform_indices = @transform_1, window_bounds = array<i64: 512, 512>}, {pipeline_mode = #tpu.pipeline_mode<synchronous>, transform_indices = @transform_2, window_bounds = array<i64: 1, 512>}, {pipeline_mode = #tpu.pipeline_mode<synchronous>, transform_indices = @transform_3, window_bounds = array<i64: 1, 1>}, {transform_indices = @transform_4, window_bounds = array<i64: 1, 8, 1>}]} {
    %c0_i32 = arith.constant 0 : i32
    %0 = arith.cmpi eq, %arg1, %c0_i32 : i32
    %1 = arith.extui %0 : i1 to i32
    %c0_i32_0 = arith.constant 0 : i32
    %2 = arith.cmpi ne, %1, %c0_i32_0 : i32
    scf.if %2 {
      %c0_9 = arith.constant 0 : index
      %c0_10 = arith.constant 0 : index
      %17 = vector.load %arg2[%c0_9, %c0_10] : memref<8x128xf32, #tpu.memory_space<vmem>>, vector<8x128xf32>
      %c0_11 = arith.constant 0 : index
      %c0_12 = arith.constant 0 : index
      %18 = vector.load %arg7[%c0_11, %c0_12] : memref<8x512xf32, #tpu.memory_space<vmem>>, vector<8x128xf32>
      tpu.vector_store %arg7[%c0_11, %c0_12], %17 {strides = array<i32>} : memref<8x512xf32, #tpu.memory_space<vmem>>, vector<8x128xf32>,
      %cst_13 = arith.constant -5.000000e-01 : f32
      %19 = vector.broadcast %cst_13 : f32 to vector<8x128xf32>
      %20 = arith.subf %17, %19 : vector<8x128xf32>
      %cst_14 = arith.constant 0.000000e+00 : f32
      %21 = vector.broadcast %cst_14 : f32 to vector<8x128xf32>
      %22 = arith.maximumf %20, %21 : vector<8x128xf32>
      %c0_15 = arith.constant 0 : index
      %c128 = arith.constant 128 : index
      %23 = vector.load %arg7[%c0_15, %c128] : memref<8x512xf32, #tpu.memory_space<vmem>>, vector<8x128xf32>
      tpu.vector_store %arg7[%c0_15, %c128], %22 {strides = array<i32>} : memref<8x512xf32, #tpu.memory_space<vmem>>, vector<8x128xf32>,
      %cst_16 = arith.constant 0.000000e+00 : f32
      %24 = vector.broadcast %cst_16 : f32 to vector<8x128xf32>
      %25 = arith.subf %17, %24 : vector<8x128xf32>
      %cst_17 = arith.constant 0.000000e+00 : f32
      %26 = vector.broadcast %cst_17 : f32 to vector<8x128xf32>
      %27 = arith.maximumf %25, %26 : vector<8x128xf32>
      %c0_18 = arith.constant 0 : index
      %c256 = arith.constant 256 : index
      %28 = vector.load %arg7[%c0_18, %c256] : memref<8x512xf32, #tpu.memory_space<vmem>>, vector<8x128xf32>
      tpu.vector_store %arg7[%c0_18, %c256], %27 {strides = array<i32>} : memref<8x512xf32, #tpu.memory_space<vmem>>, vector<8x128xf32>,
      %cst_19 = arith.constant 5.000000e-01 : f32
      %29 = vector.broadcast %cst_19 : f32 to vector<8x128xf32>
      %30 = arith.subf %17, %29 : vector<8x128xf32>
      %cst_20 = arith.constant 0.000000e+00 : f32
      %31 = vector.broadcast %cst_20 : f32 to vector<8x128xf32>
      %32 = arith.maximumf %30, %31 : vector<8x128xf32>
      %c0_21 = arith.constant 0 : index
      %c384 = arith.constant 384 : index
      %33 = vector.load %arg7[%c0_21, %c384] : memref<8x512xf32, #tpu.memory_space<vmem>>, vector<8x128xf32>
      tpu.vector_store %arg7[%c0_21, %c384], %32 {strides = array<i32>} : memref<8x512xf32, #tpu.memory_space<vmem>>, vector<8x128xf32>,
      %cst_22 = arith.constant 0.000000e+00 : f32
      %34 = vector.broadcast %cst_22 : f32 to vector<8x512xf32>
      %c0_23 = arith.constant 0 : index
      %c0_24 = arith.constant 0 : index
      %35 = vector.load %arg8[%c0_23, %c0_24] : memref<8x512xf32, #tpu.memory_space<vmem>>, vector<8x512xf32>
      tpu.vector_store %arg8[%c0_23, %c0_24], %34 {strides = array<i32>} : memref<8x512xf32, #tpu.memory_space<vmem>>, vector<8x512xf32>,
    } else {
    }
    %c1_i32 = arith.constant 1 : i32
    %3 = arith.muli %arg0, %c1_i32 : i32
    %4 = arith.addi %3, %arg1 : i32
    %c512_i32 = arith.constant 512 : i32
    %5 = arith.muli %4, %c512_i32 : i32
    %6 = tpu.assume_multiple %5, 512 : i32
    %c0 = arith.constant 0 : index
    %7 = arith.index_cast %6 : i32 to index
    %8 = vector.load %arg7[%c0, %7] : memref<8x512xf32, #tpu.memory_space<vmem>>, vector<8x512xf32>
    %c0_1 = arith.constant 0 : index
    %c0_2 = arith.constant 0 : index
    %9 = vector.load %arg8[%c0_1, %c0_2] : memref<8x512xf32, #tpu.memory_space<vmem>>, vector<8x512xf32>
    %c0_3 = arith.constant 0 : index
    %c0_4 = arith.constant 0 : index
    %10 = vector.load %arg3[%c0_3, %c0_4] : memref<512x512xf32, #tpu.memory_space<vmem>>, vector<512x512xf32>
    %cst = arith.constant dense<0.000000e+00> : vector<8x512xf32>
    %11 = tpu.matmul %8, %10, %cst {dimension_numbers = #tpu.dot_dimension_numbers<[1], [0], [0], [1], [0, 0, 1, 1], [], []>} : vector<8x512xf32>, vector<512x512xf32>, vector<8x512xf32> -> vector<8x512xf32>
    %12 = arith.addf %9, %11 : vector<8x512xf32>
    %c0_5 = arith.constant 0 : index
    %c0_6 = arith.constant 0 : index
    %13 = vector.load %arg8[%c0_5, %c0_6] : memref<8x512xf32, #tpu.memory_space<vmem>>, vector<8x512xf32>
    tpu.vector_store %arg8[%c0_5, %c0_6], %12 {strides = array<i32>} : memref<8x512xf32, #tpu.memory_space<vmem>>, vector<8x512xf32>,
    %c0_i32_7 = arith.constant 0 : i32
    %14 = arith.cmpi eq, %arg1, %c0_i32_7 : i32
    %15 = arith.extui %14 : i1 to i32
    %c0_i32_8 = arith.constant 0 : i32
    %16 = arith.cmpi ne, %15, %c0_i32_8 : i32
    scf.if %16 {
      %c0_9 = arith.constant 0 : index
      %c0_10 = arith.constant 0 : index
      %17 = vector.load %arg7[%c0_9, %c0_10] : memref<8x512xf32, #tpu.memory_space<vmem>>, vector<8x512xf32>
      %c0_i32_11 = arith.constant 0 : i32
      %18 = arith.cmpi eq, %arg0, %c0_i32_11 : i32
      %cst_12 = arith.constant 1.000000e+00 : f32
      %cst_13 = arith.constant 0.000000e+00 : f32
      %19 = arith.select %18, %cst_12, %cst_13 : f32
      %c0_14 = arith.constant 0 : index
      %c0_15 = arith.constant 0 : index
      %20 = vector.load %arg8[%c0_14, %c0_15] : memref<8x512xf32, #tpu.memory_space<vmem>>, vector<8x512xf32>
      %c0_16 = arith.constant 0 : index
      %c0_17 = arith.constant 0 : index
      %21 = vector.load %arg4[%c0_16, %c0_17] : memref<1x512xf32, #tpu.memory_space<vmem>>, vector<1x512xf32>
      %22 = vector.broadcast %19 : f32 to vector<1x512xf32>
      %23 = arith.mulf %22, %21 : vector<1x512xf32>
      %24 = vector.broadcast %23 : vector<1x512xf32> to vector<8x512xf32>
      %25 = arith.addf %20, %24 : vector<8x512xf32>
      %26 = arith.mulf %25, %17 : vector<8x512xf32>
      %cst_18 = arith.constant dense<0.000000e+00> : vector<8xf32>
      %27 = vector.multi_reduction <add>, %26, %cst_18 [1] : vector<8x512xf32> to vector<8xf32>
      %28 = vector.shape_cast %27 : vector<8xf32> to vector<8x1xf32>
      %c0_19 = arith.constant 0 : index
      %c0_20 = arith.constant 0 : index
      %29 = vector.load %arg5[%c0_19, %c0_20] : memref<1x1xf32, #tpu.memory_space<vmem>>, vector<1x1xf32>
      %30 = vector.broadcast %19 : f32 to vector<1x1xf32>
      %31 = arith.mulf %30, %29 : vector<1x1xf32>
      %32 = vector.broadcast %31 : vector<1x1xf32> to vector<8x1xf32>
      %33 = arith.addf %28, %32 : vector<8x1xf32>
      %34 = vector.shape_cast %33 : vector<8x1xf32> to vector<1x8x1xf32>
      %c0_21 = arith.constant 0 : index
      %c0_22 = arith.constant 0 : index
      %c0_23 = arith.constant 0 : index
      %35 = vector.load %arg6[%c0_21, %c0_22, %c0_23] : memref<1x8x1xf32, #tpu.memory_space<vmem>>, vector<1x8x1xf32>
      tpu.vector_store %arg6[%c0_21, %c0_22, %c0_23], %34 {strides = array<i32>} : memref<1x8x1xf32, #tpu.memory_space<vmem>>, vector<1x8x1xf32>,
    } else {
    }
    return
  }
  func.func @transform_0(%arg0: i32, %arg1: i32) -> (i32, i32) {
    %c0_i32 = arith.constant 0 : i32
    %c0_i32_0 = arith.constant 0 : i32
    %c0_i32_1 = arith.constant 0 : i32
    return %c0_i32, %c0_i32_0 : i32, i32
  }
  func.func @transform_1(%arg0: i32, %arg1: i32) -> (i32, i32) {
    %c1_i32 = arith.constant 1 : i32
    %0 = arith.muli %arg0, %c1_i32 : i32
    %1 = arith.addi %0, %arg1 : i32
    %c0_i32 = arith.constant 0 : i32
    %c0_i32_0 = arith.constant 0 : i32
    return %1, %c0_i32 : i32, i32
  }
  func.func @transform_2(%arg0: i32, %arg1: i32) -> (i32, i32) {
    %c0_i32 = arith.constant 0 : i32
    %c0_i32_0 = arith.constant 0 : i32
    %c0_i32_1 = arith.constant 0 : i32
    return %c0_i32, %c0_i32_0 : i32, i32
  }
  func.func @transform_3(%arg0: i32, %arg1: i32) -> (i32, i32) {
    %c0_i32 = arith.constant 0 : i32
    %c0_i32_0 = arith.constant 0 : i32
    %c0_i32_1 = arith.constant 0 : i32
    return %c0_i32, %c0_i32_0 : i32, i32
  }
  func.func @transform_4(%arg0: i32, %arg1: i32) -> (i32, i32, i32) {
    %c0_i32 = arith.constant 0 : i32
    %c0_i32_0 = arith.constant 0 : i32
    %c0_i32_1 = arith.constant 0 : i32
    return %arg0, %c0_i32, %c0_i32_0 : i32, i32, i32
  }
}

</mosaic_0001>

<bundles_post_ra>
// kernel: tpu_custom_call.1
= control target key start
LH: loop header
LB: loop body
LE: loop exit
PB: predicated region body
PF: predicated region fallthrough
CT: control target
= control target key end

     0   :  { %s819_s0 = inlined_call_operand.hbm [shape: f32[8,128], index: 0, kind: input, shape index: {}]   ;;  %s820_s1 = inlined_call_operand.hbm [shape: f32[512,512], index: 1, kind: input, shape index: {}]   ;;  %s821_s2 = inlined_call_operand.vmem [shape: f32[1,512], index: 2, kind: input, shape index: {}]   ;;  %s822_s3 = inlined_call_operand.<no memory space> [shape: f32[1,1], index: 3, kind: input, shape index: {}]   ;;  %s823_s4 = inlined_call_operand.vmem [shape: f32[1,8,1], index: 4, kind: output, shape index: {}]  }
   0x1   :  { %v9_v0 = vstv %s822_s3 }
   0x2   :  { %10 = vst [vmem:[#allocation4] sm:$0x1] %v9_v0 }
   0x3   :  { %11 = vsyncpa [#allocation6], 0 }
   0x4   :  { %12 = vsyncpa [#allocation8], 0  ;;  %s752_s17 = smov [#allocation5]   ;;  %s753_s19 = smov [#allocation7]  }
   0x5   :  { %s19_s18 = sshll.u32 %s752_s17, 4  ;;  %s33_s20 = sshll.u32 %s753_s19, 4  ;;  %s20_s18 = int_to_ptr.vmem [resolvable:$true] %s19_s18  ;;  %s34_s20 = int_to_ptr.vmem [resolvable:$true] %s33_s20 }
   0x6   :  { %s716_s21 = scalar_lea.vmem %s20_s18, 128  ;;  %p721_p1 = scmp.lt.s32.totalorder %s20_s18, %s20_s18 }
   0x7   :  { %p717_p0 = scmp.ne.s32.totalorder %s20_s18, %s716_s21  ;;  %p722_p2 = scmp.lt.s32.totalorder %s716_s21, %s716_s21 }
   0x9   :  { %p723_p3 = por %p722_p2, %p721_p1 }
   0xb   :  { %p724_p4 = pnand %p723_p3, %p717_p0 }
   0xd   :  { %727 = shalt.err (!%p724_p4)
}
   0xe   :  { %22 = dma.hbm_to_vmem [thread:$0]  %s819_s0, 128, %s20_s18, [#allocation6]  }
   0xf   :  { %s736_s3 = scalar_lea.vmem %s34_s20, 32768  ;;  %p741_p6 = scmp.lt.s32.totalorder %s34_s20, %s34_s20 }
  0x10   :  { %p737_p5 = scmp.ne.s32.totalorder %s34_s20, %s736_s3  ;;  %p742_p7 = scmp.lt.s32.totalorder %s736_s3, %s736_s3 }
  0x12   :  { %p743_p8 = por %p742_p7, %p741_p6 }
  0x14   :  { %p744_p9 = pnand %p743_p8, %p737_p5 }
  0x16   :  { %747 = shalt.err (!%p744_p9)
}
  0x17   :  { %s754_s24 = smov 512   ;;  %s755_s25 = smov 32  }
  0x18   :  { %39 = dma.hbm_to_vmem [thread:$0]  %s820_s1, 32768, %s34_s20, [#allocation8], %s754_s24, %s754_s24, %s755_s25  }
  0x19   :  { %748 = dma.done.wait [#allocation6], 128  }
  0x1a   :  { %749 = vsyncadd [#allocation6], 4294967168 }
  0x1b   :  { %750 = dma.done.wait [#allocation8], 32768  }
  0x1c   :  { %751 = vsyncadd [#allocation8], 4294934528  ;;  %v145_v1 = vld [vmem:[#allocation7 + $0x1e8] sm:$0xff]  ;;  %v144_v3 = vld [vmem:[#allocation7 + $0x1e0] sm:$0xff]  ;;  %vm691_vm0 = vcmask 7168  }
  0x1d   :  { %v273_v2 = vld [vmem:[#allocation7 + $0x5e8] sm:$0xff]  ;;  %340 = vmatprep.subr.mxu0 %v145_v1  ;;  %v272_v4 = vld [vmem:[#allocation7 + $0x5e0] sm:$0xff] }
  0x1e   :  { %411 = vmatprep.subr.mxu1 %v273_v2  ;;  %v141_v5 = vld [vmem:[#allocation7 + $0x1c8] sm:$0xff]  ;;  %341 = vmatpush1.msra.mxu0 %v144_v3  ;;  %v140_v7 = vld [vmem:[#allocation7 + $0x1c0] sm:$0xff] }
  0x1f   :  { %v269_v6 = vld [vmem:[#allocation7 + $0x5c8] sm:$0xff]  ;;  %412 = vmatpush1.msra.mxu1 %v272_v4  ;;  %v268_v8 = vld [vmem:[#allocation7 + $0x5c0] sm:$0xff]  ;;  %342 = vmatprep.subr.mxu0 %v141_v5 }
  0x20   :  { %v137_v9 = vld [vmem:[#allocation7 + $0x1a8] sm:$0xff]  ;;  %413 = vmatprep.subr.mxu1 %v269_v6  ;;  %v136_v11 = vld [vmem:[#allocation7 + $0x1a0] sm:$0xff]  ;;  %343 = vmatpush1.msra.mxu0 %v140_v7 }
  0x21   :  { %v265_v10 = vld [vmem:[#allocation7 + $0x5a8] sm:$0xff]  ;;  %v264_v12 = vld [vmem:[#allocation7 + $0x5a0] sm:$0xff]  ;;  %414 = vmatpush1.msra.mxu1 %v268_v8  ;;  %344 = vmatprep.subr.mxu0 %v137_v9 }
  0x22   :  { %v133_v13 = vld [vmem:[#allocation7 + $0x188] sm:$0xff]  ;;  %415 = vmatprep.subr.mxu1 %v265_v10  ;;  %v132_v15 = vld [vmem:[#allocation7 + $0x180] sm:$0xff]  ;;  %345 = vmatpush1.msra.mxu0 %v136_v11 }
  0x23   :  { %v261_v14 = vld [vmem:[#allocation7 + $0x588] sm:$0xff]  ;;  %v260_v16 = vld [vmem:[#allocation7 + $0x580] sm:$0xff]  ;;  %416 = vmatpush1.msra.mxu1 %v264_v12  ;;  %346 = vmatprep.subr.mxu0 %v133_v13 }
  0x24   :  { %v129_v17 = vld [vmem:[#allocation7 + $0x168] sm:$0xff]  ;;  %417 = vmatprep.subr.mxu1 %v261_v14  ;;  %v128_v19 = vld [vmem:[#allocation7 + $0x160] sm:$0xff]  ;;  %347 = vmatpush1.msra.mxu0 %v132_v15 }
  0x25   :  { %v257_v18 = vld [vmem:[#allocation7 + $0x568] sm:$0xff]  ;;  %v256_v20 = vld [vmem:[#allocation7 + $0x560] sm:$0xff]  ;;  %418 = vmatpush1.msra.mxu1 %v260_v16  ;;  %348 = vmatprep.subr.mxu0 %v129_v17 }
  0x26   :  { %v125_v21 = vld [vmem:[#allocation7 + $0x148] sm:$0xff]  ;;  %419 = vmatprep.subr.mxu1 %v257_v18  ;;  %v124_v23 = vld [vmem:[#allocation7 + $0x140] sm:$0xff]  ;;  %349 = vmatpush1.msra.mxu0 %v128_v19 }
  0x27   :  { %v253_v22 = vld [vmem:[#allocation7 + $0x548] sm:$0xff]  ;;  %v252_v24 = vld [vmem:[#allocation7 + $0x540] sm:$0xff]  ;;  %420 = vmatpush1.msra.mxu1 %v256_v20  ;;  %350 = vmatprep.subr.mxu0 %v125_v21 }
  0x28   :  { %v121_v25 = vld [vmem:[#allocation7 + $0x128] sm:$0xff]  ;;  %421 = vmatprep.subr.mxu1 %v253_v22  ;;  %v120_v27 = vld [vmem:[#allocation7 + $0x120] sm:$0xff]  ;;  %351 = vmatpush1.msra.mxu0 %v124_v23 }
  0x29   :  { %v249_v26 = vld [vmem:[#allocation7 + $0x528] sm:$0xff]  ;;  %v248_v28 = vld [vmem:[#allocation7 + $0x520] sm:$0xff]  ;;  %422 = vmatpush1.msra.mxu1 %v252_v24  ;;  %352 = vmatprep.subr.mxu0 %v121_v25 }
  0x2a   :  { %v117_v29 = vld [vmem:[#allocation7 + $0x108] sm:$0xff]  ;;  %423 = vmatprep.subr.mxu1 %v249_v26  ;;  %v116_v31 = vld [vmem:[#allocation7 + $0x100] sm:$0xff]  ;;  %353 = vmatpush1.msra.mxu0 %v120_v27 }
  0x2b   :  { %v245_v30 = vld [vmem:[#allocation7 + $0x508] sm:$0xff]  ;;  %v244_v32 = vld [vmem:[#allocation7 + $0x500] sm:$0xff]  ;;  %424 = vmatpush1.msra.mxu1 %v248_v28  ;;  %354 = vmatprep.subr.mxu0 %v117_v29 }
  0x2c   :  { %v113_v33 = vld [vmem:[#allocation7 + $0xe8] sm:$0xff]  ;;  %425 = vmatprep.subr.mxu1 %v245_v30  ;;  %v112_v35 = vld [vmem:[#allocation7 + $0xe0] sm:$0xff]  ;;  %355 = vmatpush1.msra.mxu0 %v116_v31 }
  0x2d   :  { %v241_v34 = vld [vmem:[#allocation7 + $0x4e8] sm:$0xff]  ;;  %v240_v36 = vld [vmem:[#allocation7 + $0x4e0] sm:$0xff]  ;;  %426 = vmatpush1.msra.mxu1 %v244_v32  ;;  %356 = vmatprep.subr.mxu0 %v113_v33 }
  0x2e   :  { %v109_v37 = vld [vmem:[#allocation7 + $0xc8] sm:$0xff]  ;;  %427 = vmatprep.subr.mxu1 %v241_v34  ;;  %v108_v39 = vld [vmem:[#allocation7 + $0xc0] sm:$0xff]  ;;  %357 = vmatpush1.msra.mxu0 %v112_v35 }
  0x2f   :  { %v237_v38 = vld [vmem:[#allocation7 + $0x4c8] sm:$0xff]  ;;  %v236_v40 = vld [vmem:[#allocation7 + $0x4c0] sm:$0xff]  ;;  %428 = vmatpush1.msra.mxu1 %v240_v36  ;;  %358 = vmatprep.subr.mxu0 %v109_v37 }
  0x30   :  { %v105_v41 = vld [vmem:[#allocation7 + $0xa8] sm:$0xff]  ;;  %429 = vmatprep.subr.mxu1 %v237_v38  ;;  %v104_v43 = vld [vmem:[#allocation7 + $0xa0] sm:$0xff]  ;;  %359 = vmatpush1.msra.mxu0 %v108_v39 }
  0x31   :  { %v233_v42 = vld [vmem:[#allocation7 + $0x4a8] sm:$0xff]  ;;  %v232_v44 = vld [vmem:[#allocation7 + $0x4a0] sm:$0xff]  ;;  %430 = vmatpush1.msra.mxu1 %v236_v40  ;;  %360 = vmatprep.subr.mxu0 %v105_v41 }
  0x32   :  { %v101_v45 = vld [vmem:[#allocation7 + $0x88] sm:$0xff]  ;;  %431 = vmatprep.subr.mxu1 %v233_v42  ;;  %v100_v47 = vld [vmem:[#allocation7 + $0x80] sm:$0xff]  ;;  %361 = vmatpush1.msra.mxu0 %v104_v43 }
  0x33   :  { %v229_v46 = vld [vmem:[#allocation7 + $0x488] sm:$0xff]  ;;  %v228_v48 = vld [vmem:[#allocation7 + $0x480] sm:$0xff]  ;;  %432 = vmatpush1.msra.mxu1 %v232_v44  ;;  %362 = vmatprep.subr.mxu0 %v101_v45 }
  0x34   :  { %v97_v49 = vld [vmem:[#allocation7 + $0x68] sm:$0xff]  ;;  %433 = vmatprep.subr.mxu1 %v229_v46  ;;  %v96_v51 = vld [vmem:[#allocation7 + $0x60] sm:$0xff]  ;;  %363 = vmatpush1.msra.mxu0 %v100_v47 }
  0x35   :  { %v225_v50 = vld [vmem:[#allocation7 + $0x468] sm:$0xff]  ;;  %v224_v52 = vld [vmem:[#allocation7 + $0x460] sm:$0xff]  ;;  %434 = vmatpush1.msra.mxu1 %v228_v48  ;;  %364 = vmatprep.subr.mxu0 %v97_v49  ;;  %v790_v49 = vld [vmem:[#allocation5] sm:$0xff] }
  0x36   :  { %v93_v53 = vld [vmem:[#allocation7 + $0x48] sm:$0xff]  ;;  %435 = vmatprep.subr.mxu1 %v225_v50  ;;  %v92_v55 = vld [vmem:[#allocation7 + $0x40] sm:$0xff]  ;;  %365 = vmatpush1.msra.mxu0 %v96_v51 }
  0x37   :  { %v221_v54 = vld [vmem:[#allocation7 + $0x448] sm:$0xff]  ;;  %v220_v56 = vld [vmem:[#allocation7 + $0x440] sm:$0xff]  ;;  %436 = vmatpush1.msra.mxu1 %v224_v52  ;;  %366 = vmatprep.subr.mxu0 %v93_v53 }
  0x38   :  { %v89_v57 = vld [vmem:[#allocation7 + $0x28] sm:$0xff]  ;;  %437 = vmatprep.subr.mxu1 %v221_v54  ;;  %v88_v59 = vld [vmem:[#allocation7 + $0x20] sm:$0xff]  ;;  %367 = vmatpush1.msra.mxu0 %v92_v55 }
  0x39   :  { %v217_v58 = vld [vmem:[#allocation7 + $0x428] sm:$0xff]  ;;  %v216_v60 = vld [vmem:[#allocation7 + $0x420] sm:$0xff]  ;;  %438 = vmatpush1.msra.mxu1 %v220_v56  ;;  %368 = vmatprep.subr.mxu0 %v89_v57  ;;  %v701_v56 = vadd.f32 0.5, %v790_v49 }
  0x3a   :  { %v85_v61 = vld [vmem:[#allocation7 + $0x8] sm:$0xff]  ;;  %439 = vmatprep.subr.mxu1 %v217_v58  ;;  %v84_v63 = vld [vmem:[#allocation7] sm:$0xff]  ;;  %369 = vmatpush1.msra.mxu0 %v88_v59  ;;  %v702_v59 = vadd.f32 -0.5, %v790_v49 }
  0x3b   :  { %v213_v62 = vld [vmem:[#allocation7 + $0x408] sm:$0xff]  ;;  %v212_v0 = vld [vmem:[#allocation7 + $0x400] sm:$0xff]  ;;  %440 = vmatpush1.msra.mxu1 %v216_v60  ;;  %370 = vmatprep.subr.mxu0 %v85_v61 }
  0x3c   :  { %v209_v1 = vld [vmem:[#allocation7 + $0x3e8] sm:$0xff]  ;;  %441 = vmatprep.subr.mxu1 %v213_v62  ;;  %v208_v3 = vld [vmem:[#allocation7 + $0x3e0] sm:$0xff]  ;;  %371 = vmatpush1.msra.mxu0 %v84_v63 }
  0x3d   :  { %v337_v2 = vld [vmem:[#allocation7 + $0x7e8] sm:$0xff]  ;;  %v336_v4 = vld [vmem:[#allocation7 + $0x7e0] sm:$0xff]  ;;  %442 = vmatpush1.msra.mxu1 %v212_v0  ;;  %372 = vmatprep.subr.mxu0 %v209_v1 }
  0x3e   :  { %v205_v5 = vld [vmem:[#allocation7 + $0x3c8] sm:$0xff]  ;;  %443 = vmatprep.subr.mxu1 %v337_v2  ;;  %v204_v7 = vld [vmem:[#allocation7 + $0x3c0] sm:$0xff]  ;;  %373 = vmatpush2.msra.mxu0 %v208_v3  ;;  %v794_v2 = vmax.f32 %v701_v56, 0.0  ;;  %v99_v56 = vld [vmem:[#allocation7 + $0x78] sm:$0xff] }
  0x3f   :  { %v333_v6 = vld [vmem:[#allocation7 + $0x7c8] sm:$0xff]  ;;  %v332_v8 = vld [vmem:[#allocation7 + $0x7c0] sm:$0xff]  ;;  %444 = vmatpush2.msra.mxu1 %v336_v4  ;;  %374 = vmatprep.subr.mxu0 %v205_v5  ;;  %v796_v4 = vmax.f32 %v702_v59, 0.0  ;;  %v226_v59 = vld [vmem:[#allocation7 + $0x470] sm:$0xff] }
  0x40   :  { %v201_v9 = vld [vmem:[#allocation7 + $0x3a8] sm:$0xff]  ;;  %445 = vmatprep.subr.mxu1 %v333_v6  ;;  %v200_v11 = vld [vmem:[#allocation7 + $0x3a0] sm:$0xff]  ;;  %375 = vmatpush2.msra.mxu0 %v204_v7  ;;  %v799_v6 = vmax.f32 %v790_v49, 0.0  ;;  %v147_v7 = vld [vmem:[#allocation7 + $0x1f8] sm:$0xff] }
  0x41   :  { %v329_v10 = vld [vmem:[#allocation7 + $0x7a8] sm:$0xff]  ;;  %v328_v12 = vld [vmem:[#allocation7 + $0x7a0] sm:$0xff]  ;;  %446 = vmatpush2.msra.mxu1 %v332_v8  ;;  %376 = vmatprep.subr.mxu0 %v201_v9  ;;  %v275_v8 = vld [vmem:[#allocation7 + $0x5f8] sm:$0xff] }
  0x42   :  { %v197_v13 = vld [vmem:[#allocation7 + $0x388] sm:$0xff]  ;;  %447 = vmatprep.subr.mxu1 %v329_v10  ;;  %v196_v15 = vld [vmem:[#allocation7 + $0x380] sm:$0xff]  ;;  %377 = vmatpush2.msra.mxu0 %v200_v11  ;;  %v146_v9 = vld [vmem:[#allocation7 + $0x1f0] sm:$0xff] }
  0x43   :  { %v325_v14 = vld [vmem:[#allocation7 + $0x788] sm:$0xff]  ;;  %v324_v16 = vld [vmem:[#allocation7 + $0x780] sm:$0xff]  ;;  %448 = vmatpush2.msra.mxu1 %v328_v12  ;;  %378 = vmatprep.subr.mxu0 %v197_v13  ;;  %v274_v10 = vld [vmem:[#allocation7 + $0x5f0] sm:$0xff] }
  0x44   :  { %v193_v17 = vld [vmem:[#allocation7 + $0x368] sm:$0xff]  ;;  %449 = vmatprep.subr.mxu1 %v325_v14  ;;  %v192_v19 = vld [vmem:[#allocation7 + $0x360] sm:$0xff]  ;;  %379 = vmatpush2.msra.mxu0 %v196_v15  ;;  %v143_v11 = vld [vmem:[#allocation7 + $0x1d8] sm:$0xff] }
  0x45   :  { %v321_v18 = vld [vmem:[#allocation7 + $0x768] sm:$0xff]  ;;  %v320_v20 = vld [vmem:[#allocation7 + $0x760] sm:$0xff]  ;;  %450 = vmatpush2.msra.mxu1 %v324_v16  ;;  %380 = vmatprep.subr.mxu0 %v193_v17  ;;  %v271_v12 = vld [vmem:[#allocation7 + $0x5d8] sm:$0xff] }
  0x46   :  { %v189_v21 = vld [vmem:[#allocation7 + $0x348] sm:$0xff]  ;;  %451 = vmatprep.subr.mxu1 %v321_v18  ;;  %v188_v23 = vld [vmem:[#allocation7 + $0x340] sm:$0xff]  ;;  %381 = vmatpush2.msra.mxu0 %v192_v19  ;;  %v142_v13 = vld [vmem:[#allocation7 + $0x1d0] sm:$0xff] }
  0x47   :  { %v317_v22 = vld [vmem:[#allocation7 + $0x748] sm:$0xff]  ;;  %v316_v24 = vld [vmem:[#allocation7 + $0x740] sm:$0xff]  ;;  %452 = vmatpush2.msra.mxu1 %v320_v20  ;;  %382 = vmatprep.subr.mxu0 %v189_v21  ;;  %v270_v14 = vld [vmem:[#allocation7 + $0x5d0] sm:$0xff] }
  0x48   :  { %v185_v25 = vld [vmem:[#allocation7 + $0x328] sm:$0xff]  ;;  %453 = vmatprep.subr.mxu1 %v317_v22  ;;  %v184_v27 = vld [vmem:[#allocation7 + $0x320] sm:$0xff]  ;;  %383 = vmatpush2.msra.mxu0 %v188_v23  ;;  %v139_v15 = vld [vmem:[#allocation7 + $0x1b8] sm:$0xff] }
  0x49   :  { %v313_v26 = vld [vmem:[#allocation7 + $0x728] sm:$0xff]  ;;  %v312_v28 = vld [vmem:[#allocation7 + $0x720] sm:$0xff]  ;;  %454 = vmatpush2.msra.mxu1 %v316_v24  ;;  %384 = vmatprep.subr.mxu0 %v185_v25  ;;  %v267_v16 = vld [vmem:[#allocation7 + $0x5b8] sm:$0xff] }
  0x4a   :  { %v181_v29 = vld [vmem:[#allocation7 + $0x308] sm:$0xff]  ;;  %455 = vmatprep.subr.mxu1 %v313_v26  ;;  %v180_v31 = vld [vmem:[#allocation7 + $0x300] sm:$0xff]  ;;  %385 = vmatpush2.msra.mxu0 %v184_v27  ;;  %v138_v17 = vld [vmem:[#allocation7 + $0x1b0] sm:$0xff] }
  0x4b   :  { %v309_v30 = vld [vmem:[#allocation7 + $0x708] sm:$0xff]  ;;  %v308_v32 = vld [vmem:[#allocation7 + $0x700] sm:$0xff]  ;;  %456 = vmatpush2.msra.mxu1 %v312_v28  ;;  %386 = vmatprep.subr.mxu0 %v181_v29  ;;  %v266_v18 = vld [vmem:[#allocation7 + $0x5b0] sm:$0xff] }
  0x4c   :  { %v177_v33 = vld [vmem:[#allocation7 + $0x2e8] sm:$0xff]  ;;  %457 = vmatprep.subr.mxu1 %v309_v30  ;;  %v176_v35 = vld [vmem:[#allocation7 + $0x2e0] sm:$0xff]  ;;  %387 = vmatpush2.msra.mxu0 %v180_v31  ;;  %v135_v19 = vld [vmem:[#allocation7 + $0x198] sm:$0xff] }
  0x4d   :  { %v305_v34 = vld [vmem:[#allocation7 + $0x6e8] sm:$0xff]  ;;  %v304_v36 = vld [vmem:[#allocation7 + $0x6e0] sm:$0xff]  ;;  %458 = vmatpush2.msra.mxu1 %v308_v32  ;;  %388 = vmatprep.subr.mxu0 %v177_v33  ;;  %v263_v20 = vld [vmem:[#allocation7 + $0x598] sm:$0xff] }
  0x4e   :  { %v173_v37 = vld [vmem:[#allocation7 + $0x2c8] sm:$0xff]  ;;  %459 = vmatprep.subr.mxu1 %v305_v34  ;;  %v172_v39 = vld [vmem:[#allocation7 + $0x2c0] sm:$0xff]  ;;  %389 = vmatpush2.msra.mxu0 %v176_v35  ;;  %v134_v21 = vld [vmem:[#allocation7 + $0x190] sm:$0xff] }
  0x4f   :  { %v301_v38 = vld [vmem:[#allocation7 + $0x6c8] sm:$0xff]  ;;  %v300_v40 = vld [vmem:[#allocation7 + $0x6c0] sm:$0xff]  ;;  %460 = vmatpush2.msra.mxu1 %v304_v36  ;;  %390 = vmatprep.subr.mxu0 %v173_v37  ;;  %v262_v22 = vld [vmem:[#allocation7 + $0x590] sm:$0xff] }
  0x50   :  { %v169_v41 = vld [vmem:[#allocation7 + $0x2a8] sm:$0xff]  ;;  %461 = vmatprep.subr.mxu1 %v301_v38  ;;  %v168_v43 = vld [vmem:[#allocation7 + $0x2a0] sm:$0xff]  ;;  %391 = vmatpush2.msra.mxu0 %v172_v39  ;;  %v131_v23 = vld [vmem:[#allocation7 + $0x178] sm:$0xff] }
  0x51   :  { %v297_v42 = vld [vmem:[#allocation7 + $0x6a8] sm:$0xff]  ;;  %v296_v44 = vld [vmem:[#allocation7 + $0x6a0] sm:$0xff]  ;;  %462 = vmatpush2.msra.mxu1 %v300_v40  ;;  %392 = vmatprep.subr.mxu0 %v169_v41  ;;  %v259_v24 = vld [vmem:[#allocation7 + $0x578] sm:$0xff] }
  0x52   :  { %v165_v45 = vld [vmem:[#allocation7 + $0x288] sm:$0xff]  ;;  %463 = vmatprep.subr.mxu1 %v297_v42  ;;  %v164_v47 = vld [vmem:[#allocation7 + $0x280] sm:$0xff]  ;;  %393 = vmatpush2.msra.mxu0 %v168_v43  ;;  %v130_v25 = vld [vmem:[#allocation7 + $0x170] sm:$0xff] }
  0x53   :  { %v293_v46 = vld [vmem:[#allocation7 + $0x688] sm:$0xff]  ;;  %v292_v48 = vld [vmem:[#allocation7 + $0x680] sm:$0xff]  ;;  %464 = vmatpush2.msra.mxu1 %v296_v44  ;;  %394 = vmatprep.subr.mxu0 %v165_v45  ;;  %v258_v26 = vld [vmem:[#allocation7 + $0x570] sm:$0xff] }
  0x54   :  { %v161_v50 = vld [vmem:[#allocation7 + $0x268] sm:$0xff]  ;;  %465 = vmatprep.subr.mxu1 %v293_v46  ;;  %v160_v52 = vld [vmem:[#allocation7 + $0x260] sm:$0xff]  ;;  %395 = vmatpush2.msra.mxu0 %v164_v47  ;;  %v127_v27 = vld [vmem:[#allocation7 + $0x158] sm:$0xff] }
  0x55   :  { %v289_v51 = vld [vmem:[#allocation7 + $0x668] sm:$0xff]  ;;  %v288_v53 = vld [vmem:[#allocation7 + $0x660] sm:$0xff]  ;;  %466 = vmatpush2.msra.mxu1 %v292_v48  ;;  %396 = vmatprep.subr.mxu0 %v161_v50  ;;  %v255_v28 = vld [vmem:[#allocation7 + $0x558] sm:$0xff] }
  0x56   :  { %v157_v54 = vld [vmem:[#allocation7 + $0x248] sm:$0xff]  ;;  %467 = vmatprep.subr.mxu1 %v289_v51  ;;  %v156_v57 = vld [vmem:[#allocation7 + $0x240] sm:$0xff]  ;;  %397 = vmatpush2.msra.mxu0 %v160_v52  ;;  %v126_v29 = vld [vmem:[#allocation7 + $0x150] sm:$0xff] }
  0x57   :  { %v285_v55 = vld [vmem:[#allocation7 + $0x648] sm:$0xff]  ;;  %v284_v58 = vld [vmem:[#allocation7 + $0x640] sm:$0xff]  ;;  %468 = vmatpush2.msra.mxu1 %v288_v53  ;;  %398 = vmatprep.subr.mxu0 %v157_v54  ;;  %v254_v30 = vld [vmem:[#allocation7 + $0x550] sm:$0xff] }
  0x58   :  { %v153_v60 = vld [vmem:[#allocation7 + $0x228] sm:$0xff]  ;;  %469 = vmatprep.subr.mxu1 %v285_v55  ;;  %v152_v62 = vld [vmem:[#allocation7 + $0x220] sm:$0xff]  ;;  %399 = vmatpush2.msra.mxu0 %v156_v57  ;;  %v123_v31 = vld [vmem:[#allocation7 + $0x138] sm:$0xff] }
  0x59   :  { %v281_v61 = vld [vmem:[#allocation7 + $0x628] sm:$0xff]  ;;  %v280_v63 = vld [vmem:[#allocation7 + $0x620] sm:$0xff]  ;;  %470 = vmatpush2.msra.mxu1 %v284_v58  ;;  %400 = vmatprep.subr.mxu0 %v153_v60  ;;  %v251_v32 = vld [vmem:[#allocation7 + $0x538] sm:$0xff] }
  0x5a   :  { %v149_v0 = vld [vmem:[#allocation7 + $0x208] sm:$0xff]  ;;  %471 = vmatprep.subr.mxu1 %v281_v61  ;;  %v148_v3 = vld [vmem:[#allocation7 + $0x200] sm:$0xff]  ;;  %401 = vmatpush2.msra.mxu0 %v152_v62  ;;  %v122_v33 = vld [vmem:[#allocation7 + $0x130] sm:$0xff] }
  0x5b   :  { %v277_v1 = vld [vmem:[#allocation7 + $0x608] sm:$0xff]  ;;  %472 = vmatpush2.msra.mxu1 %v280_v63  ;;  %v276_v5 = vld [vmem:[#allocation7 + $0x600] sm:$0xff]  ;;  %402 = vmatprep.subr.mxu0 %v149_v0  ;;  %v250_v34 = vld [vmem:[#allocation7 + $0x530] sm:$0xff] }
  0x5c   :  { %473 = vmatprep.subr.mxu1 %v277_v1  ;;  %403 = vmatpush2.msra.mxu0 %v148_v3  ;;  %v119_v35 = vld [vmem:[#allocation7 + $0x118] sm:$0xff]  ;;  %v118_v37 = vld [vmem:[#allocation7 + $0x110] sm:$0xff] }
  0x5d   :  { %404 = vmatprep.mubr.f32.mxu0 %v794_v2  ;;  %474 = vmatpush2.msra.mxu1 %v276_v5  ;;  %v247_v36 = vld [vmem:[#allocation7 + $0x518] sm:$0xff]  ;;  %v246_v38 = vld [vmem:[#allocation7 + $0x510] sm:$0xff] }
  0x5e   :  { %475 = vmatprep.mubr.f32.mxu1 %v796_v4  ;;  %405 = vmatmul.mubr.f32.vlgmr.msra.gmra.mxu0 %v790_v49  ;;  %v115_v39 = vld [vmem:[#allocation7 + $0xf8] sm:$0xff]  ;;  %v114_v41 = vld [vmem:[#allocation7 + $0xf0] sm:$0xff] }
  0x5f   :  { %476 = vmatmul.mubr.f32.vlgmr.msra.gmra.mxu1 %v799_v6  ;;  %482 = vmatprep.subr.mxu0 %v147_v7  ;;  %v243_v40 = vld [vmem:[#allocation7 + $0x4f8] sm:$0xff]  ;;  %v242_v42 = vld [vmem:[#allocation7 + $0x4f0] sm:$0xff] }
  0x60   :  { %553 = vmatprep.subr.mxu1 %v275_v8  ;;  %483 = vmatpush1.msra.mxu0 %v146_v9  ;;  %v111_v43 = vld [vmem:[#allocation7 + $0xd8] sm:$0xff]  ;;  %v110_v45 = vld [vmem:[#allocation7 + $0xd0] sm:$0xff] }
  0x61   :  { %554 = vmatpush1.msra.mxu1 %v274_v10  ;;  %484 = vmatprep.subr.mxu0 %v143_v11  ;;  %v239_v44 = vld [vmem:[#allocation7 + $0x4d8] sm:$0xff]  ;;  %v238_v46 = vld [vmem:[#allocation7 + $0x4d0] sm:$0xff] }
  0x62   :  { %555 = vmatprep.subr.mxu1 %v271_v12  ;;  %485 = vmatpush1.msra.mxu0 %v142_v13  ;;  %v107_v47 = vld [vmem:[#allocation7 + $0xb8] sm:$0xff]  ;;  %v106_v50 = vld [vmem:[#allocation7 + $0xb0] sm:$0xff] }
  0x63   :  { %556 = vmatpush1.msra.mxu1 %v270_v14  ;;  %486 = vmatprep.subr.mxu0 %v139_v15  ;;  %v235_v48 = vld [vmem:[#allocation7 + $0x4b8] sm:$0xff]  ;;  %v234_v51 = vld [vmem:[#allocation7 + $0x4b0] sm:$0xff] }
  0x64   :  { %557 = vmatprep.subr.mxu1 %v267_v16  ;;  %487 = vmatpush1.msra.mxu0 %v138_v17  ;;  %v103_v52 = vld [vmem:[#allocation7 + $0x98] sm:$0xff]  ;;  %v102_v54 = vld [vmem:[#allocation7 + $0x90] sm:$0xff] }
  0x65   :  { %558 = vmatpush1.msra.mxu1 %v266_v18  ;;  %488 = vmatprep.subr.mxu0 %v135_v19  ;;  %v231_v53 = vld [vmem:[#allocation7 + $0x498] sm:$0xff]  ;;  %v230_v55 = vld [vmem:[#allocation7 + $0x490] sm:$0xff] }
  0x66   :  { %559 = vmatprep.subr.mxu1 %v263_v20  ;;  %489 = vmatpush1.msra.mxu0 %v134_v21  ;;  %v227_v57 = vld [vmem:[#allocation7 + $0x478] sm:$0xff]  ;;  %v98_v58 = vld [vmem:[#allocation7 + $0x70] sm:$0xff] }
  0x67   :  { %560 = vmatpush1.msra.mxu1 %v262_v22  ;;  %490 = vmatprep.subr.mxu0 %v131_v23  ;;  %v95_v60 = vld [vmem:[#allocation7 + $0x58] sm:$0xff]  ;;  %v94_v62 = vld [vmem:[#allocation7 + $0x50] sm:$0xff] }
  0x68   :  { %561 = vmatprep.subr.mxu1 %v259_v24  ;;  %491 = vmatpush1.msra.mxu0 %v130_v25  ;;  %v223_v61 = vld [vmem:[#allocation7 + $0x458] sm:$0xff]  ;;  %v222_v63 = vld [vmem:[#allocation7 + $0x450] sm:$0xff] }
  0x69   :  { %562 = vmatpush1.msra.mxu1 %v258_v26  ;;  %492 = vmatprep.subr.mxu0 %v127_v27  ;;  %v91_v0 = vld [vmem:[#allocation7 + $0x38] sm:$0xff]  ;;  %v90_v3 = vld [vmem:[#allocation7 + $0x30] sm:$0xff] }
  0x6a   :  { %563 = vmatprep.subr.mxu1 %v255_v28  ;;  %493 = vmatpush1.msra.mxu0 %v126_v29  ;;  %v219_v1 = vld [vmem:[#allocation7 + $0x438] sm:$0xff]  ;;  %v218_v5 = vld [vmem:[#allocation7 + $0x430] sm:$0xff] }
  0x6b   :  { %564 = vmatpush1.msra.mxu1 %v254_v30  ;;  %494 = vmatprep.subr.mxu0 %v123_v31  ;;  %v87_v7 = vld [vmem:[#allocation7 + $0x18] sm:$0xff]  ;;  %v86_v9 = vld [vmem:[#allocation7 + $0x10] sm:$0xff] }
  0x6c   :  { %565 = vmatprep.subr.mxu1 %v251_v32  ;;  %495 = vmatpush1.msra.mxu0 %v122_v33  ;;  %v215_v8 = vld [vmem:[#allocation7 + $0x418] sm:$0xff]  ;;  %v214_v10 = vld [vmem:[#allocation7 + $0x410] sm:$0xff] }
  0x6d   :  { %566 = vmatpush1.msra.mxu1 %v250_v34  ;;  %496 = vmatprep.subr.mxu0 %v119_v35  ;;  %v211_v11 = vld [vmem:[#allocation7 + $0x3f8] sm:$0xff]  ;;  %v210_v13 = vld [vmem:[#allocation7 + $0x3f0] sm:$0xff] }
  0x6e   :  { %567 = vmatprep.subr.mxu1 %v247_v36  ;;  %497 = vmatpush1.msra.mxu0 %v118_v37  ;;  %v339_v12 = vld [vmem:[#allocation7 + $0x7f8] sm:$0xff]  ;;  %v338_v14 = vld [vmem:[#allocation7 + $0x7f0] sm:$0xff] }
  0x6f   :  { %568 = vmatpush1.msra.mxu1 %v246_v38  ;;  %498 = vmatprep.subr.mxu0 %v115_v39  ;;  %v207_v15 = vld [vmem:[#allocation7 + $0x3d8] sm:$0xff]  ;;  %v206_v17 = vld [vmem:[#allocation7 + $0x3d0] sm:$0xff] }
  0x70   :  { %569 = vmatprep.subr.mxu1 %v243_v40  ;;  %499 = vmatpush1.msra.mxu0 %v114_v41  ;;  %v335_v16 = vld [vmem:[#allocation7 + $0x7d8] sm:$0xff]  ;;  %v334_v18 = vld [vmem:[#allocation7 + $0x7d0] sm:$0xff] }
  0x71   :  { %570 = vmatpush1.msra.mxu1 %v242_v42  ;;  %500 = vmatprep.subr.mxu0 %v111_v43  ;;  %v203_v19 = vld [vmem:[#allocation7 + $0x3b8] sm:$0xff]  ;;  %v202_v21 = vld [vmem:[#allocation7 + $0x3b0] sm:$0xff] }
  0x72   :  { %571 = vmatprep.subr.mxu1 %v239_v44  ;;  %501 = vmatpush1.msra.mxu0 %v110_v45  ;;  %v331_v20 = vld [vmem:[#allocation7 + $0x7b8] sm:$0xff]  ;;  %v330_v22 = vld [vmem:[#allocation7 + $0x7b0] sm:$0xff] }
  0x73   :  { %572 = vmatpush1.msra.mxu1 %v238_v46  ;;  %502 = vmatprep.subr.mxu0 %v107_v47  ;;  %v199_v23 = vld [vmem:[#allocation7 + $0x398] sm:$0xff]  ;;  %v198_v25 = vld [vmem:[#allocation7 + $0x390] sm:$0xff] }
  0x74   :  { %573 = vmatprep.subr.mxu1 %v235_v48  ;;  %503 = vmatpush1.msra.mxu0 %v106_v50  ;;  %v327_v24 = vld [vmem:[#allocation7 + $0x798] sm:$0xff]  ;;  %v326_v26 = vld [vmem:[#allocation7 + $0x790] sm:$0xff] }
  0x75   :  { %574 = vmatpush1.msra.mxu1 %v234_v51  ;;  %504 = vmatprep.subr.mxu0 %v103_v52  ;;  %v195_v27 = vld [vmem:[#allocation7 + $0x378] sm:$0xff]  ;;  %v194_v29 = vld [vmem:[#allocation7 + $0x370] sm:$0xff] }
  0x76   :  { %575 = vmatprep.subr.mxu1 %v231_v53  ;;  %505 = vmatpush1.msra.mxu0 %v102_v54  ;;  %v323_v28 = vld [vmem:[#allocation7 + $0x778] sm:$0xff]  ;;  %v322_v30 = vld [vmem:[#allocation7 + $0x770] sm:$0xff] }
  0x77   :  { %576 = vmatpush1.msra.mxu1 %v230_v55  ;;  %506 = vmatprep.subr.mxu0 %v99_v56  ;;  %v191_v31 = vld [vmem:[#allocation7 + $0x358] sm:$0xff]  ;;  %v190_v33 = vld [vmem:[#allocation7 + $0x350] sm:$0xff] }
  0x78   :  { %577 = vmatprep.subr.mxu1 %v227_v57  ;;  %507 = vmatpush1.msra.mxu0 %v98_v58  ;;  %v319_v32 = vld [vmem:[#allocation7 + $0x758] sm:$0xff]  ;;  %v318_v34 = vld [vmem:[#allocation7 + $0x750] sm:$0xff] }
  0x79   :  { %578 = vmatpush1.msra.mxu1 %v226_v59  ;;  %508 = vmatprep.subr.mxu0 %v95_v60  ;;  %v187_v35 = vld [vmem:[#allocation7 + $0x338] sm:$0xff]  ;;  %v186_v37 = vld [vmem:[#allocation7 + $0x330] sm:$0xff] }
  0x7a   :  { %579 = vmatprep.subr.mxu1 %v223_v61  ;;  %509 = vmatpush1.msra.mxu0 %v94_v62  ;;  %v315_v36 = vld [vmem:[#allocation7 + $0x738] sm:$0xff]  ;;  %v314_v38 = vld [vmem:[#allocation7 + $0x730] sm:$0xff] }
  0x7b   :  { %580 = vmatpush1.msra.mxu1 %v222_v63  ;;  %510 = vmatprep.subr.mxu0 %v91_v0  ;;  %v183_v39 = vld [vmem:[#allocation7 + $0x318] sm:$0xff]  ;;  %v182_v41 = vld [vmem:[#allocation7 + $0x310] sm:$0xff] }
  0x7c   :  { %581 = vmatprep.subr.mxu1 %v219_v1  ;;  %511 = vmatpush1.msra.mxu0 %v90_v3  ;;  %v311_v40 = vld [vmem:[#allocation7 + $0x718] sm:$0xff]  ;;  %v310_v42 = vld [vmem:[#allocation7 + $0x710] sm:$0xff] }
  0x7d   :  { %582 = vmatpush1.msra.mxu1 %v218_v5  ;;  %512 = vmatprep.subr.mxu0 %v87_v7  ;;  %v179_v43 = vld [vmem:[#allocation7 + $0x2f8] sm:$0xff]  ;;  %v178_v45 = vld [vmem:[#allocation7 + $0x2f0] sm:$0xff] }
  0x7e   :  { %583 = vmatprep.subr.mxu1 %v215_v8  ;;  %513 = vmatpush1.msra.mxu0 %v86_v9  ;;  %v307_v44 = vld [vmem:[#allocation7 + $0x6f8] sm:$0xff]  ;;  %v306_v46 = vld [vmem:[#allocation7 + $0x6f0] sm:$0xff] }
  0x7f   :  { %584 = vmatpush1.msra.mxu1 %v214_v10  ;;  %514 = vmatprep.subr.mxu0 %v211_v11  ;;  %v175_v47 = vld [vmem:[#allocation7 + $0x2d8] sm:$0xff]  ;;  %v174_v50 = vld [vmem:[#allocation7 + $0x2d0] sm:$0xff] }
  0x80   :  { %585 = vmatprep.subr.mxu1 %v339_v12  ;;  %515 = vmatpush2.msra.mxu0 %v210_v13  ;;  %v303_v48 = vld [vmem:[#allocation7 + $0x6d8] sm:$0xff]  ;;  %v302_v51 = vld [vmem:[#allocation7 + $0x6d0] sm:$0xff] }
  0x81   :  { %586 = vmatpush2.msra.mxu1 %v338_v14  ;;  %516 = vmatprep.subr.mxu0 %v207_v15  ;;  %v171_v52 = vld [vmem:[#allocation7 + $0x2b8] sm:$0xff]  ;;  %v170_v54 = vld [vmem:[#allocation7 + $0x2b0] sm:$0xff]  ;;  %v649_v15 = vlaneseq }
  0x82   :  { %587 = vmatprep.subr.mxu1 %v335_v16  ;;  %517 = vmatpush2.msra.mxu0 %v206_v17  ;;  %v299_v53 = vld [vmem:[#allocation7 + $0x6b8] sm:$0xff]  ;;  %v298_v55 = vld [vmem:[#allocation7 + $0x6b0] sm:$0xff] }
  0x83   :  { %588 = vmatpush2.msra.mxu1 %v334_v18  ;;  %518 = vmatprep.subr.mxu0 %v203_v19  ;;  %v167_v56 = vld [vmem:[#allocation7 + $0x298] sm:$0xff]  ;;  %v166_v58 = vld [vmem:[#allocation7 + $0x290] sm:$0xff]  ;;  %v650_v16 = vshrl.u32 %v649_v15, 7 }
  0x84   :  { %589 = vmatprep.subr.mxu1 %v331_v20  ;;  %519 = vmatpush2.msra.mxu0 %v202_v21  ;;  %v295_v57 = vld [vmem:[#allocation7 + $0x698] sm:$0xff]  ;;  %v294_v59 = vld [vmem:[#allocation7 + $0x690] sm:$0xff] }
  0x85   :  { %590 = vmatpush2.msra.mxu1 %v330_v22  ;;  %520 = vmatprep.subr.mxu0 %v199_v23  ;;  %v163_v60 = vld [vmem:[#allocation7 + $0x278] sm:$0xff]  ;;  %v162_v62 = vld [vmem:[#allocation7 + $0x270] sm:$0xff]  ;;  %v651_v19 = vsub.s32 0, %v650_v16  ;;  %v655_v20 = vsub.s32 1, %v650_v16 }
  0x86   :  { %591 = vmatprep.subr.mxu1 %v327_v24  ;;  %521 = vmatpush2.msra.mxu0 %v198_v25  ;;  %v291_v61 = vld [vmem:[#allocation7 + $0x678] sm:$0xff]  ;;  %v290_v63 = vld [vmem:[#allocation7 + $0x670] sm:$0xff] }
  0x87   :  { %592 = vmatpush2.msra.mxu1 %v326_v26  ;;  %522 = vmatprep.subr.mxu0 %v195_v27  ;;  %v159_v0 = vld [vmem:[#allocation7 + $0x258] sm:$0xff]  ;;  %v158_v3 = vld [vmem:[#allocation7 + $0x250] sm:$0xff] }
  0x88   :  { %593 = vmatprep.subr.mxu1 %v323_v28  ;;  %523 = vmatpush2.msra.mxu0 %v194_v29  ;;  %v287_v1 = vld [vmem:[#allocation7 + $0x658] sm:$0xff]  ;;  %v286_v5 = vld [vmem:[#allocation7 + $0x650] sm:$0xff]  ;;  %v659_v28 = vsub.s32 2, %v650_v16 }
  0x89   :  { %594 = vmatpush2.msra.mxu1 %v322_v30  ;;  %524 = vmatprep.subr.mxu0 %v191_v31  ;;  %v155_v7 = vld [vmem:[#allocation7 + $0x238] sm:$0xff]  ;;  %v154_v9 = vld [vmem:[#allocation7 + $0x230] sm:$0xff]  ;;  %v663_v31 = vsub.s32 3, %v650_v16 }
  0x8a   :  { %595 = vmatprep.subr.mxu1 %v319_v32  ;;  %525 = vmatpush2.msra.mxu0 %v190_v33  ;;  %v283_v8 = vld [vmem:[#allocation7 + $0x638] sm:$0xff]  ;;  %v282_v10 = vld [vmem:[#allocation7 + $0x630] sm:$0xff] }
  0x8b   :  { %596 = vmatpush2.msra.mxu1 %v318_v34  ;;  %526 = vmatprep.subr.mxu0 %v187_v35  ;;  %v151_v11 = vld [vmem:[#allocation7 + $0x218] sm:$0xff]  ;;  %v150_v13 = vld [vmem:[#allocation7 + $0x210] sm:$0xff] }
  0x8c   :  { %597 = vmatprep.subr.mxu1 %v315_v36  ;;  %527 = vmatpush2.msra.mxu0 %v186_v37  ;;  %v279_v12 = vld [vmem:[#allocation7 + $0x618] sm:$0xff]  ;;  %v278_v14 = vld [vmem:[#allocation7 + $0x610] sm:$0xff] }
  0x8d   :  { %598 = vmatpush2.msra.mxu1 %v314_v38  ;;  %528 = vmatprep.subr.mxu0 %v183_v39  ;;  %v645_v21 = vld [vmem:[%s821_s2] sm:$0xf] }
  0x8e   :  { %599 = vmatprep.subr.mxu1 %v311_v40  ;;  %529 = vmatpush2.msra.mxu0 %v182_v41  ;;  %v652_v25 = vrot.slane %v645_v21, %v651_v19  ;;  %v656_v27 = vrot.slane %v645_v21, %v655_v20  ;;  %v660_v32 = vrot.slane %v645_v21, %v659_v28 }
  0x8f   :  { %600 = vmatpush2.msra.mxu1 %v310_v42  ;;  %530 = vmatprep.subr.mxu0 %v179_v43  ;;  %v664_v38 = vrot.slane %v645_v21, %v663_v31 }
  0x90   :  { %601 = vmatprep.subr.mxu1 %v307_v44  ;;  %531 = vmatpush2.msra.mxu0 %v178_v45 }
  0x91   :  { %602 = vmatpush2.msra.mxu1 %v306_v46  ;;  %532 = vmatprep.subr.mxu0 %v175_v47 }
  0x92   :  { %603 = vmatprep.subr.mxu1 %v303_v48  ;;  %533 = vmatpush2.msra.mxu0 %v174_v50  ;;  %v703_v50 = vld [vmem:[#allocation4] ss:$0 sm:$0xff] }
  0x93   :  { %604 = vmatpush2.msra.mxu1 %v302_v51  ;;  %534 = vmatprep.subr.mxu0 %v171_v52 }
  0x94   :  { %605 = vmatprep.subr.mxu1 %v299_v53  ;;  %535 = vmatpush2.msra.mxu0 %v170_v54 }
  0x95   :  { %606 = vmatpush2.msra.mxu1 %v298_v55  ;;  %536 = vmatprep.subr.mxu0 %v167_v56 }
  0x96   :  { %607 = vmatprep.subr.mxu1 %v295_v57  ;;  %537 = vmatpush2.msra.mxu0 %v166_v58 }
  0x97   :  { %608 = vmatpush2.msra.mxu1 %v294_v59  ;;  %538 = vmatprep.subr.mxu0 %v163_v60 }
  0x98   :  { %609 = vmatprep.subr.mxu1 %v291_v61  ;;  %539 = vmatpush2.msra.mxu0 %v162_v62 }
  0x99   :  { %610 = vmatpush2.msra.mxu1 %v290_v63  ;;  %540 = vmatprep.subr.mxu0 %v159_v0 }
  0x9a   :  { %611 = vmatprep.subr.mxu1 %v287_v1  ;;  %541 = vmatpush2.msra.mxu0 %v158_v3 }
  0x9b   :  { %612 = vmatpush2.msra.mxu1 %v286_v5  ;;  %542 = vmatprep.subr.mxu0 %v155_v7 }
  0x9c   :  { %613 = vmatprep.subr.mxu1 %v283_v8  ;;  %543 = vmatpush2.msra.mxu0 %v154_v9 }
  0x9d   :  { %614 = vmatpush2.msra.mxu1 %v282_v10  ;;  %544 = vmatprep.subr.mxu0 %v151_v11 }
  0x9e   :  { %615 = vmatprep.subr.mxu1 %v279_v12  ;;  %545 = vmatpush2.msra.mxu0 %v150_v13 }
  0x9f   :  { %546 = vmatprep.mubr.f32.mxu0 %v794_v2  ;;  %616 = vmatpush2.msra.mxu1 %v278_v14 }
  0xa0   :  { %617 = vmatprep.mubr.f32.mxu1 %v796_v4  ;;  %547 = vmatmul.mubr.f32.vlgmr.msra.gmra.mxu0 %v790_v49 }
  0xa1   :  { %618 = vmatmul.mubr.f32.vlgmr.msra.gmra.mxu1 %v799_v6 }
 0x11e   :  { %v406_v17 = vpop.f32.mrf.mxu0 }
 0x11f   :  { %v477_v18 = vpop.f32.mrf.mxu1 }
 0x120   :  { %v408_v22 = vpop.f32.mrf.mxu0  ;;  %v478_v24 = vadd.f32 %v477_v18, %v406_v17 }
 0x121   :  { %v479_v23 = vpop.f32.mrf.mxu1 }
 0x122   :  { %v480_v26 = vadd.f32 %v479_v23, %v408_v22  ;;  %v669_v29 = vadd.f32 %v652_v25, %v478_v24 }
 0x124   :  { %v670_v30 = vadd.f32 %v656_v27, %v480_v26  ;;  %v673_v35 = vmul.f32 %v669_v29, %v790_v49 }
 0x126   :  { %v674_v36 = vmul.f32 %v670_v30, %v794_v2 }
 0x128   :  { %v677_v45 = vadd.f32 %v674_v36, %v673_v35 }
 0x160   :  { %v548_v33 = vpop.f32.mrf.mxu0 }
 0x161   :  { %v619_v34 = vpop.f32.mrf.mxu1 }
 0x162   :  { %v620_v37 = vadd.f32 %v619_v34, %v548_v33  ;;  %v550_v39 = vpop.f32.mrf.mxu0 }
 0x163   :  { %v621_v40 = vpop.f32.mrf.mxu1 }
 0x164   :  { %v671_v41 = vadd.f32 %v660_v32, %v620_v37  ;;  %v622_v42 = vadd.f32 %v621_v40, %v550_v39 }
 0x166   :  { %v672_v43 = vadd.f32 %v664_v38, %v622_v42  ;;  %v675_v44 = vmul.f32 %v671_v41, %v799_v6 }
 0x168   :  { %v676_v46 = vmul.f32 %v672_v43, %v796_v4  ;;  %v678_v47 = vadd.f32 %v677_v45, %v675_v44 }
 0x16a   :  { %v679_v48 = vadd.f32 %v678_v47, %v676_v46 }
 0x16c   :  { %680 = vadd.xlane.f32.xlu0 %v679_v48 }
 0x1f5   :  { %v681_v51 = vpop.xlane.xlu0 %680 }
 0x1f6   :  { %v690_v49 = vadd.f32 %v703_v50, %v681_v51 }
 0x1f8   :  { %692 = vst.msk [vmem:[%s823_s4] sm:$0xff] %vm691_vm0, %v690_v49 }
 0x1f9   :  { %697 = vsyncpa [#allocation6], 1 }
 0x1fa   :  { %698 = vsyncpa [#allocation8], 1 }

</bundles_post_ra>
